<compile_context>
chip_gen: v7x
topology: tpu7x:2x2x1
jax: 0.10.0
libtpu: 0.0.40
codegen_flags: <defaults>
</compile_context>

<pallas_src>
import jax
import jax.numpy as jnp
from jax import lax
from jax.experimental import pallas as pl
from jax.experimental.pallas import tpu as pltpu


# ---------------------------------------------------------------------------
# Kernels (inputs are slot-major: x_ref is [2, TB, N])
# ---------------------------------------------------------------------------

def folded_kernel(x_ref, w_ref, o_ref):
    """out = (x0 + x1) @ W   with W = (Wu @ We)^T.  Used when N < 2*Ne."""
    xsum = x_ref[0] + x_ref[1]                        # [TB, N] dense VPU add
    o_ref[...] = jnp.dot(
        xsum, w_ref[...], preferred_element_type=jnp.float32
    ).astype(o_ref.dtype)


def lowrank_kernel(x_ref, we_ref, wu_ref, o_ref):
    """out = ((x0 + x1) @ We^T) @ Wu^T.  Used in the reduced regime N >= 2*Ne.

    Both contractions use dot_general with explicit contracting dims so no
    weight transpose is materialized (neither in the wrapper nor in-kernel).
    """
    xsum = x_ref[0] + x_ref[1]                        # [TB, N]
    h = lax.dot_general(                              # [TB, Ne] = xsum @ We^T
        xsum, we_ref[...],
        dimension_numbers=(((1,), (1,)), ((), ())),
        preferred_element_type=jnp.float32)
    out = lax.dot_general(                            # [TB, N]  = h @ Wu^T
        h, wu_ref[...],
        dimension_numbers=(((1,), (1,)), ((), ())),
        preferred_element_type=jnp.float32)
    o_ref[...] = out.astype(o_ref.dtype)


# ---------------------------------------------------------------------------
# One-time, setup-side weight preparation
# ---------------------------------------------------------------------------

def fold_weights(we, wu):
    """W[n, m] = sum_e We[e, n] * Wu[m, e]  == (Wu @ We)^T, no transpose op."""
    return lax.dot_general(
        we, wu,
        dimension_numbers=(((0,), (1,)), ((), ())),
        preferred_element_type=jnp.float32)


def prepare_params(we, wu, *, mode="auto"):
    """Setup-time weight prep.  mode="auto" folds only when it shrinks both
    weight bytes and MACs (N < 2*Ne); otherwise keeps the low-rank pair."""
    Ne, N = we.shape
    assert wu.shape == (N, Ne)
    if mode == "auto":
        mode = "folded" if N < 2 * Ne else "lowrank"
    if mode == "folded":
        return ("folded", (fold_weights(we, wu),))
    assert mode == "lowrank"
    return ("lowrank", (we, wu))


# ---------------------------------------------------------------------------
# Wrapper
# ---------------------------------------------------------------------------

def linear_reduced_model(inputs, params, *, batch_tile=128):
    """inputs: [B, 2, N] f32; params from prepare_params(We, Wu)."""
    mode, weights = params
    B, two, N = inputs.shape
    assert two == 2

    # Slot-major relayout (one tiny contiguous transpose per call): makes the
    # in-kernel slot add a dense VPU add on (sublane=B, lane=N) tiles.
    x = jnp.transpose(inputs, (1, 0, 2))              # [2, B, N]

    # Batch-tile grid: single step at small B, amortized launch + megacore
    # split at large B.
    tb = B if B <= batch_tile else batch_tile
    assert B % tb == 0, "TODO(synk): pad/mask ragged batch tiles"
    grid = (B // tb,)

    x_spec = pl.BlockSpec((2, tb, N), lambda i: (0, i, 0))
    out_spec = pl.BlockSpec((tb, N), lambda i: (i, 0))

    if mode == "folded":
        (w,) = weights
        assert w.shape == (N, N)
        kernel = folded_kernel
        w_specs = [pl.BlockSpec((N, N), lambda i: (0, 0))]       # resident
        flops = 2 * B * N * N + B * N
        bytes_accessed = 4 * (2 * B * N + N * N + B * N)
    else:
        we, wu = weights
        Ne = we.shape[0]
        kernel = lowrank_kernel
        w_specs = [pl.BlockSpec((Ne, N), lambda i: (0, 0)),       # resident
                   pl.BlockSpec((N, Ne), lambda i: (0, 0))]
        flops = 4 * B * N * Ne + B * N
        bytes_accessed = 4 * (2 * B * N + 2 * N * Ne + B * N)

    return pl.pallas_call(
        kernel,
        out_shape=jax.ShapeDtypeStruct((B, N), inputs.dtype),
        grid=grid,
        in_specs=[x_spec] + w_specs,
        out_specs=out_spec,
        compiler_params=pltpu.CompilerParams(
            dimension_semantics=("parallel",)),   # 2 TCs on v7x; no-op v5e/v6e
        cost_estimate=pl.CostEstimate(
            flops=flops, transcendentals=0, bytes_accessed=bytes_accessed),
    )(x, *weights)


# ---------------------------------------------------------------------------
# Reference + demo
# ---------------------------------------------------------------------------

def reference(inputs, we, wu):
    vstart = inputs[:, 0, :] @ we.T
    vgoal = inputs[:, 1, :] @ we.T
    return (vstart + vgoal) @ wu.T


if __name__ == "__main__":
    # Small shapes consistent with the module; B=8 keeps rows sublane-aligned.
    B, num_nodes, Ne = 8, 16, 32

    key = jax.random.PRNGKey(0)
    k_in, k_we, k_wu = jax.random.split(key, 3)

    inputs = jax.random.normal(k_in, (B, 2, num_nodes), dtype=jnp.float32)

    # PyTorch-style uniform(-1/sqrt(fan_in), 1/sqrt(fan_in)) init.
    we = jax.random.uniform(
        k_we, (Ne, num_nodes), dtype=jnp.float32,
        minval=-1.0 / jnp.sqrt(num_nodes), maxval=1.0 / jnp.sqrt(num_nodes))
    wu = jax.random.uniform(
        k_wu, (num_nodes, Ne), dtype=jnp.float32,
        minval=-1.0 / jnp.sqrt(Ne), maxval=1.0 / jnp.sqrt(Ne))

    ref = reference(inputs, we, wu)

    # Auto mode: N=16 < 2*Ne=64 -> folded single-matmul path is cheaper.
    out_folded = jax.block_until_ready(
        linear_reduced_model(inputs, prepare_params(we, wu, mode="auto")))
    # Exercise the low-rank path too (the one used in the true reduced regime).
    out_lowrank = jax.block_until_ready(
        linear_reduced_model(inputs, prepare_params(we, wu, mode="lowrank")))

    assert out_folded.shape == (B, num_nodes)
    assert out_lowrank.shape == (B, num_nodes)
    assert jnp.allclose(out_folded, ref, atol=1e-5, rtol=1e-5)
    assert jnp.allclose(out_lowrank, ref, atol=1e-5, rtol=1e-5)

    print("KERNEL_OK")
</pallas_src>

<mosaic_0001>
module attributes {stable_mosaic.version = 11 : i64} {
  func.func @folded_kernel(%arg0: i32, %arg1: memref<2x8x16xf32, #tpu.memory_space<vmem>>, %arg2: memref<16x16xf32, #tpu.memory_space<vmem>>, %arg3: memref<8x16xf32, #tpu.memory_space<vmem>>) attributes {dimension_semantics = [#tpu.dimension_semantics<parallel>], iteration_bounds = array<i64: 1>, scalar_prefetch = 0 : i64, scratch_operands = 0 : i64, tpu.core_type = #tpu.core_type<tc>, window_params = [{transform_indices = @transform_0, window_bounds = array<i64: 2, 8, 16>}, {pipeline_mode = #tpu.pipeline_mode<synchronous>, transform_indices = @transform_1, window_bounds = array<i64: 16, 16>}, {transform_indices = @transform_2, window_bounds = array<i64: 8, 16>}]} {
    %c0 = arith.constant 0 : index
    %c0_0 = arith.constant 0 : index
    %c0_1 = arith.constant 0 : index
    %0 = vector.load %arg1[%c0, %c0_0, %c0_1] : memref<2x8x16xf32, #tpu.memory_space<vmem>>, vector<1x8x16xf32>
    %1 = vector.shape_cast %0 : vector<1x8x16xf32> to vector<8x16xf32>
    %c1 = arith.constant 1 : index
    %c0_2 = arith.constant 0 : index
    %c0_3 = arith.constant 0 : index
    %2 = vector.load %arg1[%c1, %c0_2, %c0_3] : memref<2x8x16xf32, #tpu.memory_space<vmem>>, vector<1x8x16xf32>
    %3 = vector.shape_cast %2 : vector<1x8x16xf32> to vector<8x16xf32>
    %4 = arith.addf %1, %3 : vector<8x16xf32>
    %c0_4 = arith.constant 0 : index
    %c0_5 = arith.constant 0 : index
    %5 = vector.load %arg2[%c0_4, %c0_5] : memref<16x16xf32, #tpu.memory_space<vmem>>, vector<16x16xf32>
    %cst = arith.constant dense<0.000000e+00> : vector<8x16xf32>
    %6 = tpu.matmul %4, %5, %cst {dimension_numbers = #tpu.dot_dimension_numbers<[1], [0], [0], [1], [0, 0, 1, 1], [], []>} : vector<8x16xf32>, vector<16x16xf32>, vector<8x16xf32> -> vector<8x16xf32>
    %c0_6 = arith.constant 0 : index
    %c0_7 = arith.constant 0 : index
    %7 = vector.load %arg3[%c0_6, %c0_7] : memref<8x16xf32, #tpu.memory_space<vmem>>, vector<8x16xf32>
    tpu.vector_store %arg3[%c0_6, %c0_7], %6 {strides = array<i32>} : memref<8x16xf32, #tpu.memory_space<vmem>>, vector<8x16xf32>,
    return
  }
  func.func @transform_0(%arg0: i32) -> (i32, i32, i32) {
    %c0_i32 = arith.constant 0 : i32
    %c0_i32_0 = arith.constant 0 : i32
    %c0_i32_1 = arith.constant 0 : i32
    return %c0_i32, %arg0, %c0_i32_0 : i32, i32, i32
  }
  func.func @transform_1(%arg0: i32) -> (i32, i32) {
    %c0_i32 = arith.constant 0 : i32
    %c0_i32_0 = arith.constant 0 : i32
    %c0_i32_1 = arith.constant 0 : i32
    return %c0_i32, %c0_i32_0 : i32, i32
  }
  func.func @transform_2(%arg0: i32) -> (i32, i32) {
    %c0_i32 = arith.constant 0 : i32
    %c0_i32_0 = arith.constant 0 : i32
    return %arg0, %c0_i32 : i32, i32
  }
}

</mosaic_0001>

<bundles_post_ra>
// kernel: tpu_custom_call.1
= control target key start
LH: loop header
LB: loop body
LE: loop exit
PB: predicated region body
PF: predicated region fallthrough
CT: control target
= control target key end

     0   :  { %7 = vsyncpa [#allocation3], 0  ;;  %s290_s0 = inlined_call_operand.hbm [shape: f32[2,8,16], index: 0, kind: input, shape index: {}]   ;;  %s291_s1 = inlined_call_operand.hbm [shape: f32[16,16], index: 1, kind: input, shape index: {}]   ;;  %s292_s2 = inlined_call_operand.hbm [shape: f32[8,16], index: 2, kind: output, shape index: {}]  }
   0x1   :  { %8 = vsyncpa [#allocation6], 0 }
   0x2   :  { %9 = vsyncpa [#allocation4], 0  ;;  %s231_s9 = smov [#allocation2]   ;;  %s159_s13 = scalar_lea.hbm %s290_s0, 256 }
   0x3   :  { %s15_s10 = sshll.u32 %s231_s9, 4  ;;  %p160_p0 = scmp.ne.s32.totalorder %s290_s0, %s159_s13  ;;  %s16_s10 = int_to_ptr.vmem [resolvable:$true] %s15_s10 }
   0x4   :  { %p163_p1 = scmp.lt.u32.totalorder %s159_s13, %s290_s0 }
   0x6   :  { %p165_p2 = pnand %p163_p1, %p160_p0 }
   0x8   :  { %168 = shalt.err (!%p165_p2)
}
   0x9   :  { %s169_s18 = scalar_lea.vmem %s16_s10, 256  ;;  %p174_p4 = scmp.lt.s32.totalorder %s16_s10, %s16_s10 }
   0xa   :  { %p170_p3 = scmp.ne.s32.totalorder %s16_s10, %s169_s18  ;;  %p175_p5 = scmp.lt.s32.totalorder %s169_s18, %s169_s18 }
   0xc   :  { %p176_p6 = por %p175_p5, %p174_p4 }
   0xe   :  { %p177_p7 = pnand %p176_p6, %p170_p3 }
  0x10   :  { %180 = shalt.err (!%p177_p7)
}
  0x11   :  { %s232_s19 = smov 128   ;;  %s233_s20 = smov 8  }
  0x12   :  { %21 = dma.hbm_to_vmem [thread:$0]  %s290_s0, 256, %s16_s10, [#allocation3], %s232_s19, %s232_s19, %s233_s20  }
  0x13   :  { %s234_s23 = smov [#allocation5]   ;;  %s181_s27 = scalar_lea.hbm %s291_s1, 256 }
  0x14   :  { %s27_s24 = sshll.u32 %s234_s23, 4  ;;  %p182_p8 = scmp.ne.s32.totalorder %s291_s1, %s181_s27  ;;  %s28_s24 = int_to_ptr.vmem [resolvable:$true] %s27_s24 }
  0x15   :  { %p185_p9 = scmp.lt.u32.totalorder %s181_s27, %s291_s1 }
  0x17   :  { %p187_p10 = pnand %p185_p9, %p182_p8 }
  0x19   :  { %190 = shalt.err (!%p187_p10)
}
  0x1a   :  { %s191_s4 = scalar_lea.vmem %s28_s24, 256  ;;  %p196_p12 = scmp.lt.s32.totalorder %s28_s24, %s28_s24 }
  0x1b   :  { %p192_p11 = scmp.ne.s32.totalorder %s28_s24, %s191_s4  ;;  %p197_p13 = scmp.lt.s32.totalorder %s191_s4, %s191_s4 }
  0x1d   :  { %p198_p0 = por %p197_p13, %p196_p12 }
  0x1f   :  { %p199_p1 = pnand %p198_p0, %p192_p11 }
  0x21   :  { %202 = shalt.err (!%p199_p1)
}
  0x22   :  { %33 = dma.hbm_to_vmem [thread:$0]  %s291_s1, 256, %s28_s24, [#allocation6], %s232_s19, %s232_s19, %s233_s20  }
  0x23   :  { %225 = dma.done.wait [#allocation3], 256  }
  0x24   :  { %226 = vsyncadd [#allocation3], 4294967040 }
  0x25   :  { %227 = dma.done.wait [#allocation6], 256  }
  0x26   :  { %228 = vsyncadd [#allocation6], 4294967040  ;;  %v235_v0 = vmov 0.0|0.0   ;;  %vm236_vm0 = vmmov 0   ;;  %v237_v1 = vmov 0.0   ;;  %v44_v2 = vld [vmem:[#allocation5] sm:$0xff] }
  0x27   :  { %148 = vmatprep.subr.bf16.mxu0 %v235_v0  ;;  %145 = vmatprep.mubr.msk.f32.mxu0 %vm236_vm0, %v237_v1  ;;  %v45_v3 = vld [vmem:[#allocation5 + $0x8] sm:$0xff]  ;;  %v40_v4 = vld [vmem:[#allocation2] sm:$0xff]  ;;  %v42_v6 = vld [vmem:[#allocation2 + $0x8] sm:$0xff]  ;;  %vm46_vm1 = vcmask 130048   ;;  %s238_s6 = smov [#allocation7]  }
  0x28   :  { %v149_v5 = vpack.c.bf16 %v45_v3, %v44_v2  ;;  %v43_v7 = vadd.f32 %v42_v6, %v40_v4  ;;  %s127_s1 = sshll.u32 %s238_s6, 4  ;;  %s128_s1 = int_to_ptr.vmem [resolvable:$true] %s127_s1 }
  0x29   :  { %s203_s7 = scalar_lea.vmem %s128_s1, 128  ;;  %p208_p3 = scmp.lt.s32.totalorder %s128_s1, %s128_s1 }
  0x2a   :  { %150 = vmatpush3.bf16.msra.mxu0 %v149_v5  ;;  %p204_p2 = scmp.ne.s32.totalorder %s128_s1, %s203_s7  ;;  %p209_p4 = scmp.lt.s32.totalorder %s203_s7, %s203_s7 }
  0x2c   :  { %p210_p5 = por %p209_p4, %p208_p3 }
  0x2d   :  { %146 = vmatmul.mubr.msk.f32.vlgmr.msra.gmra.mrb[0].mxu0 %vm46_vm1, %v43_v7 }
  0x2e   :  { %p211_p6 = pnand %p210_p5, %p204_p2 }
 0x100   :  { %v116_v8 = vpop.f32.mrb[0].mxu0 }
 0x101   :  { %120 = vst.msk [vmem:[#allocation7] sm:$0xff] %vm46_vm1, %v116_v8  ;;  %v147_v9 = vpop.f32.mrb[1].mxu0 }
 0x102   :  { %214 = shalt.err (!%p211_p6)
}
 0x103   :  { %s215_s10 = scalar_lea.hbm %s292_s2, 128 }
 0x104   :  { %p216_p7 = scmp.ne.s32.totalorder %s292_s2, %s215_s10  ;;  %p219_p8 = scmp.lt.u32.totalorder %s215_s10, %s292_s2 }
 0x106   :  { %p221_p9 = pnand %p219_p8, %p216_p7 }
 0x108   :  { %224 = shalt.err (!%p221_p9)
}
 0x109   :  { %130 = dma.vmem_to_hbm [thread:$0]  %s128_s1, 128, %s292_s2, [#allocation4]  }
 0x10a   :  { %229 = dma.done.wait [#allocation4], 128  }
 0x10b   :  { %230 = vsyncadd [#allocation4], 4294967168 }
 0x10c   :  { %134 = vsyncpa [#allocation3], 1 }
 0x10d   :  { %135 = vsyncpa [#allocation6], 1 }
 0x10e   :  { %136 = vsyncpa [#allocation4], 1 }

</bundles_post_ra>
